<compile_context>
chip_gen: v5e
topology: v5e:2x2
jax: 0.10.0
libtpu: 0.0.40
codegen_flags: <defaults>
</compile_context>

<pallas_src>
import numpy as np
import jax
import jax.numpy as jnp
from jax.experimental import pallas as pl
from jax.experimental.pallas import tpu as pltpu

SLOWFAST_ALPHA = 4
_MAX_DMAS_IN_FLIGHT = 16            # in-flight DMA window (semaphore count cap)
_PER_CHANNEL_SPLIT_BYTES = 32 * 1024  # split per channel when a H*W run >= this


def _linspace_indices(t: int, n: int) -> np.ndarray:
    """Reproduce torch.linspace(0, t-1, n).long(): float32 arithmetic, truncation."""
    # TODO(synk): torch may accumulate linspace differently (higher precision /
    # different recurrence); verify indices against torch for production T.
    if n <= 0:
        return np.zeros((0,), dtype=np.int32)
    if n == 1:
        return np.zeros((1,), dtype=np.int32)
    step = np.float32(t - 1) / np.float32(n - 1)
    vals = np.arange(n, dtype=np.float32) * step
    idx = np.trunc(vals).astype(np.int64)
    return np.clip(idx, 0, t - 1).astype(np.int32)


def _make_gather_kernel(copies, n_sems: int):
    """Kernel gathering temporal frames via direct HBM->HBM DMAs.

    copies: static list of (channel_or_None, src_t, dst_i) tuples.  All offsets
    are Python ints, so every DMA descriptor is fully static.
    """
    n_copies = len(copies)

    def kernel(x_hbm, o_hbm, sems):
        # x_hbm: (C, T, HW) in HBM, o_hbm: (C, n_slow, HW) in HBM,
        # sems: DMA semaphores (one per in-flight copy).
        def make(j):
            c, t, i = copies[j]
            if c is None:
                # One strided 3-D DMA per frame (C runs of HW elements).
                src = x_hbm.at[:, pl.ds(t, 1), :]
                dst = o_hbm.at[:, pl.ds(i, 1), :]
            else:
                # One fully contiguous DMA per (channel, frame).
                src = x_hbm.at[c, pl.ds(t, 1), :]
                dst = o_hbm.at[c, pl.ds(i, 1), :]
            return pltpu.make_async_copy(src, dst, sems.at[j % n_sems])

        # Static unroll (copy list is small and known at trace time).  When
        # n_sems == n_copies this degenerates to "start everything, then wait
        # everything"; otherwise it is an in-order ring of depth n_sems.
        for j in range(min(n_sems, n_copies)):
            make(j).start()
        for j in range(n_copies):
            make(j).wait()
            nxt = j + n_sems
            if nxt < n_copies:
                make(nxt).start()

    return kernel


def pack_pathway(frames: jax.Array):
    """frames: (C, T, H, W). Returns [slow_pathway, fast_pathway]."""
    C, T, H, W = frames.shape
    n_slow = T // SLOWFAST_ALPHA

    fast_pathway = frames  # identity (aliases the input; no compute needed)
    if n_slow == 0:
        return [frames[:, :0], fast_pathway]

    idx = _linspace_indices(T, n_slow)  # trace-time constants
    itemsize = jnp.dtype(frames.dtype).itemsize

    # Build the static copy list.  For large frames, split each frame into one
    # contiguous DMA per channel; otherwise one strided 3-D DMA per frame.
    run_bytes = H * W * itemsize
    if run_bytes >= _PER_CHANNEL_SPLIT_BYTES:
        copies = [(c, int(idx[i]), i) for i in range(n_slow) for c in range(C)]
    else:
        copies = [(None, int(idx[i]), i) for i in range(n_slow)]
    # TODO(synk): when idx is an exact arithmetic progression, the whole gather
    # could collapse to a single strided DMA per channel; not emitted here.

    n_sems = max(1, min(_MAX_DMAS_IN_FLIGHT, len(copies)))

    # Lane-dense, memory-order-preserving view: (C, T, H*W).
    x = frames.reshape(C, T, H * W)

    grid_spec = pltpu.PrefetchScalarGridSpec(
        num_scalar_prefetch=0,
        grid=(1,),  # single step; all DMAs issued/overlapped inside the body
        in_specs=[pl.BlockSpec(memory_space=pl.ANY)],   # raw HBM ref, no auto-DMA
        out_specs=pl.BlockSpec(memory_space=pl.ANY),    # raw HBM ref, DMA'd directly
        scratch_shapes=[pltpu.SemaphoreType.DMA((n_sems,))],
    )

    bytes_accessed = 2 * C * n_slow * H * W * itemsize  # HBM read + HBM write

    slow = pl.pallas_call(
        _make_gather_kernel(copies, n_sems),
        out_shape=jax.ShapeDtypeStruct((C, n_slow, H * W), frames.dtype),
        grid_spec=grid_spec,
        compiler_params=pltpu.CompilerParams(
            dimension_semantics=("arbitrary",),
        ),
        cost_estimate=pl.CostEstimate(
            flops=0, transcendentals=0, bytes_accessed=bytes_accessed
        ),
    )(x)

    slow_pathway = slow.reshape(C, n_slow, H, W)
    # TODO(synk): upstream uint8->float /255 + mean/std normalization could be
    # fused here for free (DMA-bound kernel), but it is outside PackPathway's
    # forward semantics, so it is intentionally not done.
    return [slow_pathway, fast_pathway]


def _check(frames):
    C, T, H, W = frames.shape
    n_slow = T // SLOWFAST_ALPHA
    slow, fast = pack_pathway(frames)
    jax.block_until_ready(slow)
    jax.block_until_ready(fast)
    ref_idx = jnp.asarray(_linspace_indices(T, n_slow), dtype=jnp.int32)
    slow_ref = jnp.take(frames, ref_idx, axis=1)
    assert slow.shape == (C, n_slow, H, W)
    assert fast.shape == (C, T, H, W)
    np.testing.assert_allclose(np.asarray(slow), np.asarray(slow_ref))
    np.testing.assert_allclose(np.asarray(fast), np.asarray(frames))


if __name__ == "__main__":
    key = jax.random.PRNGKey(0)

    # Small shape (combined per-frame DMA path).
    k0, k1 = jax.random.split(key)
    frames_small = jax.random.normal(k0, (4, 8, 16, 16), dtype=jnp.float32)
    _check(frames_small)

    # Medium shape exercising the per-channel contiguous-DMA path
    # (H*W*itemsize = 36 KiB >= 32 KiB threshold).
    frames_med = jax.random.normal(k1, (3, 16, 96, 96), dtype=jnp.float32)
    _check(frames_med)

    print("KERNEL_OK")
</pallas_src>

<mosaic_0001>
module attributes {stable_mosaic.version = 11 : i64} {
  func.func @kernel(%arg0: i32, %arg1: memref<4x8x256xf32, #tpu.memory_space<any>>, %arg2: memref<4x2x256xf32, #tpu.memory_space<any>>, %arg3: memref<2x!tpu.dma_semaphore, #tpu.memory_space<semaphore_mem>>) attributes {dimension_semantics = [#tpu.dimension_semantics<arbitrary>], iteration_bounds = array<i64: 1>, scalar_prefetch = 0 : i64, scratch_operands = 1 : i64, tpu.core_type = #tpu.core_type<tc>, window_params = [{}, {}]} {
    %c0_i32 = arith.constant 0 : i32
    %c0_i32_0 = arith.constant 0 : i32
    %c0_i32_1 = arith.constant 0 : i32
    %c0_i32_2 = arith.constant 0 : i32
    %0 = tpu.memref_slice %arg1[%c0_i32_0, %c0_i32_1, %c0_i32_2] : memref<4x8x256xf32, #tpu.memory_space<any>> -> memref<4x1x256xf32, #tpu.memory_space<any>>
    %c0_i32_3 = arith.constant 0 : i32
    %c0_i32_4 = arith.constant 0 : i32
    %c0_i32_5 = arith.constant 0 : i32
    %1 = tpu.memref_slice %arg2[%c0_i32_3, %c0_i32_4, %c0_i32_5] : memref<4x2x256xf32, #tpu.memory_space<any>> -> memref<4x1x256xf32, #tpu.memory_space<any>>
    %2 = tpu.memref_slice %arg3[%c0_i32] : memref<2x!tpu.dma_semaphore, #tpu.memory_space<semaphore_mem>> -> memref<1x!tpu.dma_semaphore, #tpu.memory_space<semaphore_mem>>
    %3 = tpu.memref_squeeze %2 : memref<1x!tpu.dma_semaphore, #tpu.memory_space<semaphore_mem>> -> memref<!tpu.dma_semaphore, #tpu.memory_space<semaphore_mem>>
    tpu.enqueue_dma source(%0 : memref<4x1x256xf32, #tpu.memory_space<any>>) target(%1 : memref<4x1x256xf32, #tpu.memory_space<any>>) target_semaphore(%3 : memref<!tpu.dma_semaphore, #tpu.memory_space<semaphore_mem>>)
    %c1_i32 = arith.constant 1 : i32
    %c0_i32_6 = arith.constant 0 : i32
    %c7_i32 = arith.constant 7 : i32
    %c0_i32_7 = arith.constant 0 : i32
    %4 = tpu.memref_slice %arg1[%c0_i32_6, %c7_i32, %c0_i32_7] : memref<4x8x256xf32, #tpu.memory_space<any>> -> memref<4x1x256xf32, #tpu.memory_space<any>>
    %c0_i32_8 = arith.constant 0 : i32
    %c1_i32_9 = arith.constant 1 : i32
    %c0_i32_10 = arith.constant 0 : i32
    %5 = tpu.memref_slice %arg2[%c0_i32_8, %c1_i32_9, %c0_i32_10] : memref<4x2x256xf32, #tpu.memory_space<any>> -> memref<4x1x256xf32, #tpu.memory_space<any>>
    %6 = tpu.memref_slice %arg3[%c1_i32] : memref<2x!tpu.dma_semaphore, #tpu.memory_space<semaphore_mem>> -> memref<1x!tpu.dma_semaphore, #tpu.memory_space<semaphore_mem>>
    %7 = tpu.memref_squeeze %6 : memref<1x!tpu.dma_semaphore, #tpu.memory_space<semaphore_mem>> -> memref<!tpu.dma_semaphore, #tpu.memory_space<semaphore_mem>>
    tpu.enqueue_dma source(%4 : memref<4x1x256xf32, #tpu.memory_space<any>>) target(%5 : memref<4x1x256xf32, #tpu.memory_space<any>>) target_semaphore(%7 : memref<!tpu.dma_semaphore, #tpu.memory_space<semaphore_mem>>)
    %c0_i32_11 = arith.constant 0 : i32
    %c0_i32_12 = arith.constant 0 : i32
    %c0_i32_13 = arith.constant 0 : i32
    %c0_i32_14 = arith.constant 0 : i32
    %8 = tpu.memref_slice %arg1[%c0_i32_12, %c0_i32_13, %c0_i32_14] : memref<4x8x256xf32, #tpu.memory_space<any>> -> memref<4x1x256xf32, #tpu.memory_space<any>>
    %c0_i32_15 = arith.constant 0 : i32
    %c0_i32_16 = arith.constant 0 : i32
    %c0_i32_17 = arith.constant 0 : i32
    %9 = tpu.memref_slice %arg2[%c0_i32_15, %c0_i32_16, %c0_i32_17] : memref<4x2x256xf32, #tpu.memory_space<any>> -> memref<4x1x256xf32, #tpu.memory_space<any>>
    %10 = tpu.memref_slice %arg3[%c0_i32_11] : memref<2x!tpu.dma_semaphore, #tpu.memory_space<semaphore_mem>> -> memref<1x!tpu.dma_semaphore, #tpu.memory_space<semaphore_mem>>
    %11 = tpu.memref_squeeze %10 : memref<1x!tpu.dma_semaphore, #tpu.memory_space<semaphore_mem>> -> memref<!tpu.dma_semaphore, #tpu.memory_space<semaphore_mem>>
    tpu.wait_dma2 semaphore(%11 : memref<!tpu.dma_semaphore, #tpu.memory_space<semaphore_mem>>) src(%8 : memref<4x1x256xf32, #tpu.memory_space<any>>) dst(%9 : memref<4x1x256xf32, #tpu.memory_space<any>>)
    %c1_i32_18 = arith.constant 1 : i32
    %c0_i32_19 = arith.constant 0 : i32
    %c7_i32_20 = arith.constant 7 : i32
    %c0_i32_21 = arith.constant 0 : i32
    %12 = tpu.memref_slice %arg1[%c0_i32_19, %c7_i32_20, %c0_i32_21] : memref<4x8x256xf32, #tpu.memory_space<any>> -> memref<4x1x256xf32, #tpu.memory_space<any>>
    %c0_i32_22 = arith.constant 0 : i32
    %c1_i32_23 = arith.constant 1 : i32
    %c0_i32_24 = arith.constant 0 : i32
    %13 = tpu.memref_slice %arg2[%c0_i32_22, %c1_i32_23, %c0_i32_24] : memref<4x2x256xf32, #tpu.memory_space<any>> -> memref<4x1x256xf32, #tpu.memory_space<any>>
    %14 = tpu.memref_slice %arg3[%c1_i32_18] : memref<2x!tpu.dma_semaphore, #tpu.memory_space<semaphore_mem>> -> memref<1x!tpu.dma_semaphore, #tpu.memory_space<semaphore_mem>>
    %15 = tpu.memref_squeeze %14 : memref<1x!tpu.dma_semaphore, #tpu.memory_space<semaphore_mem>> -> memref<!tpu.dma_semaphore, #tpu.memory_space<semaphore_mem>>
    tpu.wait_dma2 semaphore(%15 : memref<!tpu.dma_semaphore, #tpu.memory_space<semaphore_mem>>) src(%12 : memref<4x1x256xf32, #tpu.memory_space<any>>) dst(%13 : memref<4x1x256xf32, #tpu.memory_space<any>>)
    return
  }
}

</mosaic_0001>

<bundles_post_ra>
// kernel: tpu_custom_call.1
= control target key start
LH: loop header
LB: loop body
LE: loop exit
PB: predicated region body
PF: predicated region fallthrough
CT: control target
= control target key end

     0   :  { %s78_s12 = smov 128   ;;  %s79_s13 = smov 32   ;;  %s108_s0 = inlined_call_operand.hbm [shape: f32[4,8,256], index: 0, kind: input, shape index: {}]   ;;  %s109_s1 = inlined_call_operand.hbm [shape: f32[4,2,256], index: 1, kind: output, shape index: {}]  }
   0x1   :  { %s10_s8 = sshll.u32 %s108_s0, 4  ;;  %s12_s11 = sshll.u32 %s109_s1, 4  ;;  %s11_s8 = int_to_ptr.hbm [resolvable:$true] %s10_s8  ;;  %s13_s11 = int_to_ptr.hbm [resolvable:$true] %s12_s11 }
   0x2   :  { %17 = sst [smem:[#allocation4]] %s78_s12  ;;  %s80_s14 = smov 1  }
   0x3   :  { %19 = sst [smem:[#allocation4 + $0x1]] %s79_s13  ;;  %s24_s17 = scalar_lea.hbm %s108_s0, 7 }
   0x4   :  { %21 = sst [smem:[#allocation4 + $0x2]] %s80_s14  ;;  %s81_s18 = smov [#allocation2]  }
   0x5   :  { %s82_s19 = smov [#allocation3]   ;;  %s83_s20 = smov 0  }
   0x6   :  { %23 = dma.general %s11_s8, 128, %s13_s11, %s81_s18, %s82_s19, [#allocation4], %s83_s20, 0  }
   0x7   :  { %38 = sst [smem:[#allocation6]] %s78_s12  ;;  %s25_s23 = scalar_lea.hbm %s109_s1, 1 }
   0x8   :  { %40 = sst [smem:[#allocation6 + $0x1]] %s79_s13  ;;  %s31_s24 = sshll.u32 %s24_s17, 4  ;;  %s32_s24 = int_to_ptr.hbm [resolvable:$true] %s31_s24 }
   0x9   :  { %42 = sst [smem:[#allocation6 + $0x2]] %s80_s14  ;;  %s33_s25 = sshll.u32 %s25_s23, 4  ;;  %s34_s25 = int_to_ptr.hbm [resolvable:$true] %s33_s25 }
   0xa   :  { %s84_s26 = smov [#allocation2 + $0x1]   ;;  %s85_s27 = smov [#allocation5]  }
   0xb   :  { %44 = dma.general %s32_s24, 128, %s34_s25, %s84_s26, %s85_s27, [#allocation6], %s83_s20, 0  }
   0xc   :  { %74 = dma.done.wait [#allocation2], 128 }
   0xd   :  { %75 = vsyncadd [#allocation2], 4294967168 }
   0xe   :  { %76 = dma.done.wait [#allocation2 + $0x1], 128 }
   0xf   :  { %77 = vsyncadd [#allocation2 + $0x1], 4294967168 }
  0x10   :  { %51 = vsyncmov [#allocation2] }
  0x13   :  { %s52_s0 = vpop.sfrf %51 }
  0x14   :  { %p64_p0 = scmp.ne.s32.totalorder %s52_s0, 0 }
  0x16   :  { %56 = shalt.err (%p64_p0)  }
  0x17   :  { %58 = vsyncmov [#allocation2 + $0x1] }
  0x1a   :  { %s59_s28 = vpop.sfrf %58 }
  0x1b   :  { %p65_p1 = scmp.ne.s32.totalorder %s59_s28, 0 }
  0x1d   :  { %63 = shalt.err (%p65_p1)  }

</bundles_post_ra>
